<compile_context>
chip_gen: v6e
topology: v6e:2x2x1
jax: 0.10.0
libtpu: 0.0.40
codegen_flags: <defaults>
</compile_context>

<pallas_src>
import functools
import math

import jax
import jax.numpy as jnp
from jax import lax
from jax.experimental import pallas as pl
from jax.experimental.pallas import tpu as pltpu


def position_term_kernel(wx_ref, py_ref, out_ref, *, D, TH, C, W):
    """One tile of TH feature-map rows.

    wx_ref : (D, O_pad)      f32  W_im[:, :D].T  (x half of the weights)
    py_ref : (W, O_pad)      f32  hoisted y-projection emb_y @ W_im[:, D:].T
    out_ref: (TH, W, O_pad)       out[x, y, :] = px[x, :] + py[y, :]
    """
    Dh = D // 2

    # Per-channel constants from iota (no scalar side-input DMA):
    #   c <  D/2 : sin channel, divisor 1000^((2c+1)/D), phase 0
    #   c >= D/2 : cos channel, divisor 1000^((2(c-D/2))/D), phase pi/2 (cos = sin(.+pi/2))
    c = lax.broadcasted_iota(jnp.int32, (1, D), 1)
    is_cos = c >= Dh
    expo = jnp.where(is_cos, (c - Dh) * 2, c * 2 + 1).astype(jnp.float32)
    inv_div = jnp.exp(expo * jnp.float32(-math.log(1000.0) / D))              # (1, D)
    phase = jnp.where(is_cos, jnp.float32(math.pi / 2.0), jnp.float32(0.0))   # (1, D)

    py = py_ref[...]                        # (W, O_pad) — fetched once, resident
    wx = wx_ref[...]                        # (D, O_pad)
    x_tile0 = pl.program_id(0) * TH

    def chunk_body(t, carry):
        # x-embedding for C rows -> (C, O_pad) projection, then broadcast-add with the
        # hoisted y-projection and store the (C, W, O_pad) slab. Chunking keeps vreg
        # pressure bounded (only py + one chunk live) and the store pipeline smooth.
        x0 = x_tile0 + t * C
        xs = (x0 + lax.broadcasted_iota(jnp.int32, (C, D), 0)).astype(jnp.float32)
        emb_x = jnp.sin(xs * inv_div + phase)                                 # (C, D)
        px = jnp.dot(emb_x, wx, preferred_element_type=jnp.float32)           # (C, O_pad)
        row0 = pl.multiple_of(t * C, C)
        out_ref[pl.ds(row0, C), :, :] = (
            px[:, None, :] + py[None, :, :]).astype(out_ref.dtype)
        return carry

    lax.fori_loop(0, TH // C, chunk_body, 0, unroll=True)


def _pick_row_tile(H, W, O_pad, out_itemsize, target_block_bytes):
    """Rows per grid step: ~MiB-scale output block, >= 2 grid steps, divisor of H."""
    bytes_per_row = max(1, W * O_pad * out_itemsize)
    cap = max(1, target_block_bytes // bytes_per_row)   # block in the ~1-4 MiB range
    cap = min(cap, max(H // 2, 1))                      # keep >= 2 "parallel" steps (v7x: 2 TCs)
    cap = min(cap, H)
    best_div = 1
    for th in range(cap, 0, -1):                        # largest divisor of H <= cap
        if H % th == 0:
            best_div = th
            break
    if best_div * 4 >= cap:        # close enough to target: zero padded rows
        return best_div
    return cap                     # ragged tail (e.g. prime H): pad + one wrapper slice


def _pick_chunk_rows(TH, target=8):
    """Divisor of TH closest to `target` rows per in-kernel store chunk."""
    divs = [d for d in range(1, TH + 1) if TH % d == 0]
    return min(divs, key=lambda d: (abs(d - target), d))


def position_term_forward(W_im, feature_map_size, *,
                          target_block_bytes=2 << 20,
                          out_dtype=jnp.float32):
    """Pallas implementation of PositionTerm.forward(feature_map_size)."""
    N, _, H, Wd = feature_map_size
    O, twoD = W_im.shape
    assert twoD % 2 == 0, "input dimension must be even"
    D = twoD // 2

    W_im = jnp.asarray(W_im, jnp.float32)

    # Separability: out[x, y] = W_im[:, :D] @ emb(x) + W_im[:, D:] @ emb(y).
    wx_t = W_im[:, :D].T                                                   # (D, O)

    # Hoisted y-projection: computed ONCE here (exact divisors) instead of re-doing
    # W*D sins + a (W, D) x (D, O) matmul on every grid step inside the kernel.
    sin_div = jnp.asarray([1000.0 ** (i / D) for i in range(1, D, 2)], jnp.float32)
    cos_div = jnp.asarray([1000.0 ** (j / D) for j in range(0, D, 2)], jnp.float32)
    ys = jnp.arange(Wd, dtype=jnp.float32)[:, None]
    emb_y = jnp.concatenate([jnp.sin(ys / sin_div), jnp.cos(ys / cos_div)], axis=1)  # (Wd, D)
    py = emb_y @ W_im[:, D:].T                                             # (Wd, O)

    # Lane-dense output: pad O only when it is not already a multiple of 128.
    O_pad = max(128, ((O + 127) // 128) * 128)
    if O_pad != O:
        wx_t = jnp.pad(wx_t, ((0, 0), (0, O_pad - O)))
        py = jnp.pad(py, ((0, 0), (0, O_pad - O)))

    out_itemsize = jnp.dtype(out_dtype).itemsize
    TH = _pick_row_tile(H, Wd, O_pad, out_itemsize, target_block_bytes)
    C = _pick_chunk_rows(TH)
    H_pad = pl.cdiv(H, TH) * TH
    grid = (H_pad // TH,)

    # Explicit VMEM budget: double-buffered output block + inputs + headroom; clamped
    # above v5e's 16 MiB scoped default and well under v7x's 64 MiB physical VMEM so
    # double-buffering stays intact at large TH.
    out_block_bytes = TH * Wd * O_pad * out_itemsize
    in_bytes = (D + Wd) * O_pad * 4
    vmem_limit = int(min(max(2 * out_block_bytes + 2 * in_bytes + (4 << 20), 16 << 20),
                         48 << 20))

    out = pl.pallas_call(
        functools.partial(position_term_kernel, D=D, TH=TH, C=C, W=Wd),
        out_shape=jax.ShapeDtypeStruct((H_pad, Wd, O_pad), out_dtype),
        grid=grid,
        in_specs=[
            # Constant index_map -> each input is DMA'd once and stays resident.
            # TODO(synk): pipeline_mode=pl.Buffered(1) here would drop the redundant
            # second buffer (~(D+W)*O_pad*4 B) when squeezing maximum TH into v7x VMEM.
            pl.BlockSpec((D, O_pad), lambda i: (0, 0)),
            pl.BlockSpec((Wd, O_pad), lambda i: (0, 0)),
        ],
        out_specs=pl.BlockSpec((TH, Wd, O_pad), lambda i: (i, 0, 0)),
        compiler_params=pltpu.CompilerParams(
            dimension_semantics=("parallel",),
            vmem_limit_bytes=vmem_limit,
        ),
    )(wx_t, py)

    if H_pad != H or O_pad != O:
        # Only a real HBM copy in the (rare) padded case; TH is chosen to divide H and
        # O is only padded when not already a multiple of 128, so this is normally skipped.
        out = out[:H, :, :O]
    per_img = out.reshape(H, Wd, O, 1).astype(jnp.float32)

    # The embedding does not depend on the image index: the torch module builds N
    # identical (H, W, O, 1) tensors, so return the same array N times.
    # TODO(synk): cache per feature_map_size at the call site to avoid recomputing
    # identical outputs across repeated forward() calls.
    return [per_img for _ in range(N)]


def ref_forward(W_im, feature_map_size):
    """Pure-JAX reference mirroring the PyTorch code (for correctness check)."""
    N, _, H, Wd = feature_map_size
    O, twoD = W_im.shape
    D = twoD // 2
    sin_div = jnp.asarray([1000 ** (i / D) for i in range(1, D, 2)], jnp.float32)
    cos_div = jnp.asarray([1000 ** (j / D) for j in range(0, D, 2)], jnp.float32)
    xs = jnp.arange(H, dtype=jnp.float32)[:, None]
    ys = jnp.arange(Wd, dtype=jnp.float32)[:, None]
    emb_x = jnp.concatenate([jnp.sin(xs / sin_div), jnp.cos(xs / cos_div)], axis=1)  # (H, D)
    emb_y = jnp.concatenate([jnp.sin(ys / sin_div), jnp.cos(ys / cos_div)], axis=1)  # (W, D)
    P = jnp.concatenate(
        [jnp.broadcast_to(emb_x[:, None, :], (H, Wd, D)),
         jnp.broadcast_to(emb_y[None, :, :], (H, Wd, D))], axis=-1)                  # (H, W, 2D)
    out = jnp.einsum("od,hwd->hwo", W_im, P)[..., None]                              # (H, W, O, 1)
    return [out for _ in range(N)]


if __name__ == "__main__":
    # Small shapes consistent with the module defaults (512/256), scaled down:
    # input_dimension=64 -> 2D=128 position channels, output_dimension=128,
    # feature map 32x32 -> TH=16 rows/step, 2 "parallel" grid steps, C=8-row chunks.
    input_dimension = 64
    output_dimension = 128
    feature_map_size = [2, 4, 32, 32]   # [N, C, H, W]

    key = jax.random.PRNGKey(0)
    W_im = jax.random.normal(
        key, (output_dimension, 2 * input_dimension), dtype=jnp.float32)

    outs = position_term_forward(W_im, feature_map_size)
    outs = [jax.block_until_ready(o) for o in outs]

    refs = ref_forward(W_im, feature_map_size)
    H, Wd = feature_map_size[2], feature_map_size[3]
    for o, r in zip(outs, refs):
        assert o.shape == (H, Wd, output_dimension, 1), o.shape
        # The in-kernel x-path uses exp(-k*ln(1000)/D) reciprocal divisors and a +pi/2
        # cos fold in f32 (y-path is exact, hoisted); tolerance covers the sub-1e-3 drift.
        max_err = float(jnp.max(jnp.abs(o - r)))
        assert jnp.allclose(o, r, rtol=2e-3, atol=2e-3), max_err

    print("KERNEL_OK")
</pallas_src>

<mosaic_0001>
module attributes {stable_mosaic.version = 11 : i64} {
  func.func @position_term_kernel(%arg0: i32, %arg1: memref<64x128xf32, #tpu.memory_space<vmem>>, %arg2: memref<32x128xf32, #tpu.memory_space<vmem>>, %arg3: memref<16x32x128xf32, #tpu.memory_space<vmem>>) attributes {dimension_semantics = [#tpu.dimension_semantics<parallel>], iteration_bounds = array<i64: 2>, scalar_prefetch = 0 : i64, scratch_operands = 0 : i64, tpu.core_type = #tpu.core_type<tc>, window_params = [{pipeline_mode = #tpu.pipeline_mode<synchronous>, transform_indices = @transform_0, window_bounds = array<i64: 64, 128>}, {pipeline_mode = #tpu.pipeline_mode<synchronous>, transform_indices = @transform_1, window_bounds = array<i64: 32, 128>}, {transform_indices = @transform_2, window_bounds = array<i64: 16, 32, 128>}]} {
    %0 = tpu.iota {dimensions = array<i32: 1>} : vector<1x64xi32>
    %c32_i32 = arith.constant 32 : i32
    %1 = vector.broadcast %c32_i32 : i32 to vector<1x64xi32>
    %2 = arith.cmpi sge, %0, %1 : vector<1x64xi32>
    %c32_i32_0 = arith.constant 32 : i32
    %3 = vector.broadcast %c32_i32_0 : i32 to vector<1x64xi32>
    %4 = arith.subi %0, %3 : vector<1x64xi32>
    %c2_i32 = arith.constant 2 : i32
    %5 = vector.broadcast %c2_i32 : i32 to vector<1x64xi32>
    %6 = arith.muli %4, %5 : vector<1x64xi32>
    %c2_i32_1 = arith.constant 2 : i32
    %7 = vector.broadcast %c2_i32_1 : i32 to vector<1x64xi32>
    %8 = arith.muli %0, %7 : vector<1x64xi32>
    %c1_i32 = arith.constant 1 : i32
    %9 = vector.broadcast %c1_i32 : i32 to vector<1x64xi32>
    %10 = arith.addi %8, %9 : vector<1x64xi32>
    %11 = arith.select %2, %6, %10 : vector<1x64xi1>, vector<1x64xi32>
    %12 = arith.sitofp %11 : vector<1x64xi32> to vector<1x64xf32>
    %cst = arith.constant -0.107933678 : f32
    %13 = vector.broadcast %cst : f32 to vector<1x64xf32>
    %14 = arith.mulf %12, %13 : vector<1x64xf32>
    %15 = math.exp %14 : vector<1x64xf32>
    %cst_2 = arith.constant 1.57079637 : f32
    %cst_3 = arith.constant 0.000000e+00 : f32
    %16 = vector.broadcast %cst_2 : f32 to vector<1x64xf32>
    %17 = vector.broadcast %cst_3 : f32 to vector<1x64xf32>
    %18 = arith.select %2, %16, %17 : vector<1x64xi1>, vector<1x64xf32>
    %c0 = arith.constant 0 : index
    %c0_4 = arith.constant 0 : index
    %19 = vector.load %arg2[%c0, %c0_4] : memref<32x128xf32, #tpu.memory_space<vmem>>, vector<32x128xf32>
    %c0_5 = arith.constant 0 : index
    %c0_6 = arith.constant 0 : index
    %20 = vector.load %arg1[%c0_5, %c0_6] : memref<64x128xf32, #tpu.memory_space<vmem>>, vector<64x128xf32>
    %c16_i32 = arith.constant 16 : i32
    %21 = arith.muli %arg0, %c16_i32 : i32
    %c0_i32 = arith.constant 0 : i32
    %c8_i32 = arith.constant 8 : i32
    %22 = arith.muli %c0_i32, %c8_i32 : i32
    %23 = arith.addi %21, %22 : i32
    %24 = tpu.iota {dimensions = array<i32: 0>} : vector<8x64xi32>
    %25 = vector.broadcast %23 : i32 to vector<8x64xi32>
    %26 = arith.addi %25, %24 : vector<8x64xi32>
    %27 = arith.sitofp %26 : vector<8x64xi32> to vector<8x64xf32>
    %28 = vector.broadcast %15 : vector<1x64xf32> to vector<8x64xf32>
    %29 = arith.mulf %27, %28 : vector<8x64xf32>
    %30 = vector.broadcast %18 : vector<1x64xf32> to vector<8x64xf32>
    %31 = arith.addf %29, %30 : vector<8x64xf32>
    %32 = math.sin %31 : vector<8x64xf32>
    %cst_7 = arith.constant dense<0.000000e+00> : vector<8x128xf32>
    %33 = tpu.matmul %32, %20, %cst_7 {dimension_numbers = #tpu.dot_dimension_numbers<[1], [0], [0], [1], [0, 0, 1, 1], [], []>} : vector<8x64xf32>, vector<64x128xf32>, vector<8x128xf32> -> vector<8x128xf32>
    %c8_i32_8 = arith.constant 8 : i32
    %34 = arith.muli %c0_i32, %c8_i32_8 : i32
    %35 = tpu.assume_multiple %34, 8 : i32
    %36 = vector.shape_cast %33 : vector<8x128xf32> to vector<8x1x128xf32>
    %37 = vector.shape_cast %19 : vector<32x128xf32> to vector<1x32x128xf32>
    %38 = vector.broadcast %36 : vector<8x1x128xf32> to vector<8x32x128xf32>
    %39 = vector.broadcast %37 : vector<1x32x128xf32> to vector<8x32x128xf32>
    %40 = arith.addf %38, %39 : vector<8x32x128xf32>
    %41 = arith.index_cast %35 : i32 to index
    %c0_9 = arith.constant 0 : index
    %c0_10 = arith.constant 0 : index
    %42 = vector.load %arg3[%41, %c0_9, %c0_10] : memref<16x32x128xf32, #tpu.memory_space<vmem>>, vector<8x32x128xf32>
    tpu.vector_store %arg3[%41, %c0_9, %c0_10], %40 {strides = array<i32>} : memref<16x32x128xf32, #tpu.memory_space<vmem>>, vector<8x32x128xf32>,
    %c1_i32_11 = arith.constant 1 : i32
    %c8_i32_12 = arith.constant 8 : i32
    %43 = arith.muli %c1_i32_11, %c8_i32_12 : i32
    %44 = arith.addi %21, %43 : i32
    %45 = tpu.iota {dimensions = array<i32: 0>} : vector<8x64xi32>
    %46 = vector.broadcast %44 : i32 to vector<8x64xi32>
    %47 = arith.addi %46, %45 : vector<8x64xi32>
    %48 = arith.sitofp %47 : vector<8x64xi32> to vector<8x64xf32>
    %49 = vector.broadcast %15 : vector<1x64xf32> to vector<8x64xf32>
    %50 = arith.mulf %48, %49 : vector<8x64xf32>
    %51 = vector.broadcast %18 : vector<1x64xf32> to vector<8x64xf32>
    %52 = arith.addf %50, %51 : vector<8x64xf32>
    %53 = math.sin %52 : vector<8x64xf32>
    %cst_13 = arith.constant dense<0.000000e+00> : vector<8x128xf32>
    %54 = tpu.matmul %53, %20, %cst_13 {dimension_numbers = #tpu.dot_dimension_numbers<[1], [0], [0], [1], [0, 0, 1, 1], [], []>} : vector<8x64xf32>, vector<64x128xf32>, vector<8x128xf32> -> vector<8x128xf32>
    %c8_i32_14 = arith.constant 8 : i32
    %55 = arith.muli %c1_i32_11, %c8_i32_14 : i32
    %56 = tpu.assume_multiple %55, 8 : i32
    %57 = vector.shape_cast %54 : vector<8x128xf32> to vector<8x1x128xf32>
    %58 = vector.shape_cast %19 : vector<32x128xf32> to vector<1x32x128xf32>
    %59 = vector.broadcast %57 : vector<8x1x128xf32> to vector<8x32x128xf32>
    %60 = vector.broadcast %58 : vector<1x32x128xf32> to vector<8x32x128xf32>
    %61 = arith.addf %59, %60 : vector<8x32x128xf32>
    %62 = arith.index_cast %56 : i32 to index
    %c0_15 = arith.constant 0 : index
    %c0_16 = arith.constant 0 : index
    %63 = vector.load %arg3[%62, %c0_15, %c0_16] : memref<16x32x128xf32, #tpu.memory_space<vmem>>, vector<8x32x128xf32>
    tpu.vector_store %arg3[%62, %c0_15, %c0_16], %61 {strides = array<i32>} : memref<16x32x128xf32, #tpu.memory_space<vmem>>, vector<8x32x128xf32>,
    %c2_i32_17 = arith.constant 2 : i32
    return
  }
  func.func @transform_0(%arg0: i32) -> (i32, i32) {
    %c0_i32 = arith.constant 0 : i32
    %c0_i32_0 = arith.constant 0 : i32
    %c0_i32_1 = arith.constant 0 : i32
    return %c0_i32, %c0_i32_0 : i32, i32
  }
  func.func @transform_1(%arg0: i32) -> (i32, i32) {
    %c0_i32 = arith.constant 0 : i32
    %c0_i32_0 = arith.constant 0 : i32
    %c0_i32_1 = arith.constant 0 : i32
    return %c0_i32, %c0_i32_0 : i32, i32
  }
  func.func @transform_2(%arg0: i32) -> (i32, i32, i32) {
    %c0_i32 = arith.constant 0 : i32
    %c0_i32_0 = arith.constant 0 : i32
    %c0_i32_1 = arith.constant 0 : i32
    return %arg0, %c0_i32, %c0_i32_0 : i32, i32, i32
  }
}

</mosaic_0001>

<bundles_post_ra>
// kernel: tpu_custom_call.1
= control target key start
LH: loop header
LB: loop body
LE: loop exit
PB: predicated region body
PF: predicated region fallthrough
CT: control target
= control target key end

     0   :  { %7 = vsyncpa [#allocation3], 0  ;;  %s1733_s0 = inlined_call_operand.hbm [shape: f32[64,128], index: 0, kind: input, shape index: {}]   ;;  %s1734_s1 = inlined_call_operand.hbm [shape: f32[32,128], index: 1, kind: input, shape index: {}]   ;;  %s1735_s2 = inlined_call_operand.hbm [shape: f32[32,32,128], index: 2, kind: output, shape index: {}]  }
   0x1   :  { %8 = vsyncpa [#allocation6], 0 }
   0x2   :  { %9 = vsyncpa [#allocation4], 0 }
   0x3   :  { %11 = vsyncpa [#allocation4 + $0x1], 0  ;;  %s1307_s9 = smov 0   ;;  %s1309_s10 = smov 0  }
   0x4   :  { %s1311_s11 = smov 0   ;;  %s1313_s12 = smov 0  }
   0x5 LB: > { %s1328_s13 = sadd.s32 4294967295, %s1274_s12   ;;  %s947_s14 = sadd.s32 4294967294, %s1274_s12   ;;  %s1274_s12 = sphi %s1313_s12, %s1751_s12   ;;  %s1270_s11 = sphi %s1311_s11, %s1750_s11   ;;  %s1266_s10 = sphi %s1309_s10, %s1749_s10   ;;  %s1262_s9 = sphi %s1307_s9, %s1748_s9  }
   0x6   : > { %s1332_s15 = sadd.s32 1, %s1274_s12   ;;  %s66_s16 = sadd.s32 1, %s1270_s11 }
   0x7   : > { %s63_s17 = ssub.s32 %s1274_s12, %s1332_s15  ;;  %p76_p0 = scmp.ne.s32.totalorder %s1270_s11, %s1266_s10 }
   0x8   : > { %p64_p1 = scmp.eq.s32.totalorder %s63_s17, 0  ;;  %p77_p2 = scmp.eq.s32.totalorder %s1328_s13, 1 }
   0x9   : > { %p82_p3 = scmp.ne.s32.totalorder %s1266_s10, %s1262_s9  ;;  %p83_p4 = scmp.eq.s32.totalorder %s947_s14, 1 }
   0xa   : > { %s1343_s18 = scalar_select %p64_p1, %s1270_s11, %s66_s16  }
   0xb   : > { %p1345_p5 = por %p77_p2, %p76_p0  ;;  %p1349_p6 = por %p83_p4, %p82_p3 }
   0xc   : > { %p948_p7 = scmp.ge.s32.totalorder %s1274_s12, 1  ;;  %p90_p8 = scmp.lt.s32.totalorder %s1274_s12, 3 }
   0xd   : > { %s1738_s20 = scalar_select %p1349_p6, 1, 0 }
   0xe   : > { %p1736_p9 = scmp.eq.s32.totalorder %s1328_s13, 0  ;;  %p1356_p10 = pnand %p948_p7, %p90_p8 }
   0xf   : > { %s1276_s22 = smov [#allocation2]   ;;  %s1277_s25 = smov [#allocation5]  }
  0x10   : > { %s102_s23 = sshll.u32 %s1276_s22, 4  ;;  %p1081_p11 = pneg %p1356_p10  ;;  %s103_s23 = int_to_ptr.vmem [resolvable:$true] %s102_s23 }
  0x11   : > { %s115_s26 = sshll.u32 %s1277_s25, 4  ;;  %s1165_s27 = scalar_lea.vmem %s103_s23, 1024  ;;  %s116_s26 = int_to_ptr.vmem [resolvable:$true] %s115_s26 }
  0x12   : > { %p1364_p12 = pnand %p1736_p9, %p1081_p11  ;;  %p1166_p0 = scmp.ne.s32.totalorder %s103_s23, %s1165_s27 }
  0x13   : > { %p1173_p3 = scmp.lt.s32.totalorder %s103_s23, %s103_s23  ;;  %p1174_p4 = scmp.lt.s32.totalorder %s1165_s27, %s1165_s27 }
  0x14   : > { %p1156_p13 = pneg %p1364_p12 }
  0x15   : > { %p1175_p7 = por %p1174_p4, %p1173_p3 }
  0x16   : > { %p1168_p1 = pnand %p1166_p0, %p1156_p13 }
  0x18   : > { %p1169_p2 = pneg %p1168_p1 }
  0x1a   : > { %p1176_p8 = pnand %p1175_p7, %p1169_p2 }
  0x1c   : > { %1179 = shalt.err (!%p1176_p8)
}
  0x1d   : > { %s1278_s28 = smov 128   ;;  %s1279_s29 = smov 8  }
  0x1e   : > { %1084 = dma.hbm_to_vmem [thread:$0]  (!%p1364_p12), %s1733_s0, 1024, %s103_s23, [#allocation3], %s1278_s28, %s1278_s28, %s1279_s29  }
  0x1f   : > { %s1191_s4 = scalar_lea.vmem %s116_s26, 512  ;;  %p1199_p9 = scmp.lt.s32.totalorder %s116_s26, %s116_s26 }
  0x20   : > { %p1192_p11 = scmp.ne.s32.totalorder %s116_s26, %s1191_s4  ;;  %p1200_p6 = scmp.lt.s32.totalorder %s1191_s4, %s1191_s4 }
  0x22   : > { %p1194_p0 = pnand %p1192_p11, %p1156_p13  ;;  %p1201_p3 = por %p1200_p6, %p1199_p9 }
  0x24   : > { %p1195_p1 = pneg %p1194_p0 }
  0x26   : > { %p1202_p2 = pnand %p1201_p3, %p1195_p1 }
  0x28   : > { %1205 = shalt.err (!%p1202_p2)
}
  0x29   : > { %1087 = dma.hbm_to_vmem [thread:$0]  (!%p1364_p12), %s1734_s1, 512, %s116_s26, [#allocation6], %s1278_s28, %s1278_s28, %s1279_s29  }
  0x2a   : > { %131 = sbr.rel (%p1356_p10) target bundleno = 420 (0x1a4), region = 28  ;;  %p1741_p4 = scmp.eq.s32.totalorder (!%p1356_p10), %s1328_s13, 0 }
  0x2f   : > { %1249 = dma.done.wait (%p1741_p4), [#allocation3], 1024   ;;  %p1742_p13 = pmov %p1741_p4 }
  0x30   : > { %p1743_p7 = pmov %p1741_p4 }
  0x31   : > { %1251 = vsyncadd (%p1742_p13), [#allocation3], 4294966272 }
  0x32   : > { %1253 = dma.done.wait (%p1743_p7), [#allocation6], 512   ;;  %p1744_p6 = pmov %p1741_p4 }
  0x33   : > { %v153_v0 = vlaneseq  ;;  %v1280_v1 = vmov 0.0   ;;  %vm1281_vm0 = vmmov 0   ;;  %v177_v7 = vld [vmem:[#allocation2 + $0x38] sm:$0xff]  ;;  %v176_v8 = vld [vmem:[#allocation2 + $0x30] sm:$0xff]  ;;  %v175_v10 = vld [vmem:[#allocation2 + $0x28] sm:$0xff]  ;;  %s956_s7 = sshll.u32 %s1328_s13, 4 }
  0x34   : > { %1255 = vsyncadd (%p1744_p6), [#allocation6], 4294966784  ;;  %1025 = vmatprep.subr.mxu0 %v1280_v1  ;;  %1044 = vmatprep.subr.mxu1 %v1280_v1  ;;  %v174_v12 = vld [vmem:[#allocation2 + $0x20] sm:$0xff]  ;;  %v173_v14 = vld [vmem:[#allocation2 + $0x18] sm:$0xff]  ;;  %s520_s8 = sadd.s32 8, %s956_s7  ;;  %v181_v19 = vstv %s956_s7  ;;  %s149_s14 = sand.u32 1, %s1266_s10  }
  0x35   : > { %1041 = vmatprep.mubr.msk.f32.mxu0 %vm1281_vm0, %v1280_v1  ;;  %1060 = vmatprep.mubr.msk.f32.mxu1 %vm1281_vm0, %v1280_v1  ;;  %v154_v2 = vand.u32 127, %v153_v0  ;;  %v172_v16 = vld [vmem:[#allocation2 + $0x10] sm:$0xff]  ;;  %v171_v17 = vld [vmem:[#allocation2 + $0x8] sm:$0xff]  ;;  %v1412_v18 = vshrl.u32 %v153_v0, 7  ;;  %v521_v20 = vstv %s520_s8  ;;  %v170_v21 = vld [vmem:[#allocation2] sm:$0xff]  ;;  %s954_s16 = sshll.u32 %s149_s14, 9 }
  0x36   : > { %1026 = vmatpush3.msra.mxu0 %v177_v7  ;;  %1045 = vmatpush3.msra.mxu1 %v177_v7  ;;  %v1282_v54 = vmov 683565275   ;;  %v1283_v56 = vmov 2475754826   ;;  %v1284_v58 = vmov 2131351028  }
  0x37   : > { %v955_v3 = vadd.s32 4294967264, %v154_v2  ;;  %v158_v4 = vmul.u32 2, %v154_v2  ;;  %vm155_vm1 = vcmp.ge.s32.totalorder %v154_v2, 32  ;;  %1027 = vmatprep.subr.mxu0 %v1280_v1  ;;  %1046 = vmatprep.subr.mxu1 %v1280_v1  ;;  %v182_v22 = vadd.s32 %v181_v19, %v1412_v18  ;;  %s1540_s17 = scalar_lea.vmem [#allocation7], %s954_s16  ;;  %s1006_s21 = sshll.u32 %s1328_s13, 13 }
  0x38   : > { %1028 = vmatpush3.msra.mxu0 %v176_v8  ;;  %1047 = vmatpush3.msra.mxu1 %v176_v8  ;;  %v522_v23 = vadd.s32 %v521_v20, %v1412_v18  ;;  %v165_v27 = vsel %vm155_vm1, 1.5707964, %v1280_v1  ;;  %v1285_v60 = vmov 2102212464   ;;  %v1286_v62 = vmov 920167782   ;;  %s1671_s24 = scalar_lea.hbm %s1735_s2, %s1006_s21 }
  0x39   : > { %v157_v5 = vmul.u32 2, %v955_v3  ;;  %v159_v6 = vadd.s32 1, %v158_v4  ;;  %1029 = vmatprep.subr.mxu0 %v1280_v1  ;;  %1048 = vmatprep.subr.mxu1 %v1280_v1  ;;  %v183_v24 = vcvt.s32.f32 %v182_v22  ;;  %s874_s22 = sshll.u32 %s1540_s17, 4  ;;  %s1693_s25 = scalar_lea.sflag [#allocation4], %s149_s14  ;;  %s1673_s22 = int_to_ptr.vmem [resolvable:$true] %s874_s22 }
  0x3a   : > { %1030 = vmatpush3.msra.mxu0 %v175_v10  ;;  %1049 = vmatpush3.msra.mxu1 %v175_v10  ;;  %v523_v25 = vcvt.s32.f32 %v522_v23  ;;  %s1206_s26 = scalar_lea.vmem %s1673_s22, 8192  ;;  %s1289_s27 = smov [#allocation7]  }
  0x3b   : > { %v160_v9 = vsel %vm155_vm1, %v157_v5, %v159_v6  ;;  %1031 = vmatprep.subr.mxu0 %v1280_v1  ;;  %1050 = vmatprep.subr.mxu1 %v1280_v1  ;;  %v1287_v6 = vmov 1326507024   ;;  %p1207_p9 = scmp.ne.s32.totalorder %s1673_s22, %s1206_s26  ;;  %s1210_s28 = sshll.u32 %s1289_s27, 4  ;;  %s1211_s28 = int_to_ptr.vmem [resolvable:$false] %s1210_s28 }
  0x3c   : > { %v161_v11 = vcvt.s32.f32 %v160_v9  ;;  %1032 = vmatpush3.msra.mxu0 %v174_v12  ;;  %1051 = vmatpush3.msra.mxu1 %v174_v12  ;;  %s1212_s29 = scalar_lea.vmem %s1211_s28, 16384  ;;  %p1213_p8 = scmp.lt.s32.totalorder %s1673_s22, %s1211_s28 }
  0x3d   : > { %1033 = vmatprep.subr.mxu0 %v1280_v1  ;;  %1052 = vmatprep.subr.mxu1 %v1280_v1  ;;  %p1208_p10 = pnand %p1207_p9, %p1345_p5  ;;  %p1214_p11 = scmp.lt.s32.totalorder %s1212_s29, %s1206_s26 }
  0x3e   : > { %v162_v13 = vmul.f32 -0.10793368, %v161_v11  ;;  %1034 = vmatpush3.msra.mxu0 %v173_v14  ;;  %1053 = vmatpush3.msra.mxu1 %v173_v14 }
  0x3f   : > { %1035 = vmatprep.subr.mxu0 %v1280_v1  ;;  %1054 = vmatprep.subr.mxu1 %v1280_v1  ;;  %p1209_p12 = pneg %p1208_p10  ;;  %p1215_p0 = por %p1214_p11, %p1213_p8 }
  0x40   : > { %v163_v15 = vmul.f32 1.442695, %v162_v13  ;;  %1036 = vmatpush3.msra.mxu0 %v172_v16  ;;  %1055 = vmatpush3.msra.mxu1 %v172_v16 }
  0x41   : > { %1037 = vmatprep.subr.mxu0 %v1280_v1  ;;  %1056 = vmatprep.subr.mxu1 %v1280_v1  ;;  %p1216_p1 = pnand %p1215_p0, %p1209_p12 }
  0x42   : > { %1144 = vpow2.f32 %v163_v15  ;;  %1038 = vmatpush3.msra.mxu0 %v171_v17  ;;  %1057 = vmatpush3.msra.mxu1 %v171_v17 }
  0x43   : > { %1039 = vmatprep.subr.mxu0 %v1280_v1  ;;  %1058 = vmatprep.subr.mxu1 %v1280_v1 }
  0x44   : > { %1040 = vmatpush3.msra.mxu0 %v170_v21  ;;  %1059 = vmatpush3.msra.mxu1 %v170_v21 }
  0x4f   : > { %v1145_v26 = vpop.eup %1144 }
  0x50   : > { %v184_v28 = vmul.f32 %v1145_v26, %v183_v24  ;;  %v524_v29 = vmul.f32 %v1145_v26, %v523_v25 }
  0x52   : > { %v1422_v30 = vadd.f32 %v184_v28, %v165_v27  ;;  %v1424_v31 = vadd.f32 %v524_v29, %v165_v27 }
  0x54   : > { %v186_v32 = vand.u32 2147483647, %v1422_v30  ;;  %v189_v33 = vand.u32 2139095040, %v1422_v30  ;;  %v526_v34 = vand.u32 2147483647, %v1424_v31  ;;  %v529_v35 = vand.u32 2139095040, %v1424_v31 }
  0x55   : > { %vm188_vm0 = vcmp.lt.s32.totalorder %v1422_v30, 0 }
  0x56   : > { %v190_v36 = vshrl.u32 %v189_v33, 23  ;;  %v193_v37 = vand.u32 8388607, %v186_v32  ;;  %v530_v38 = vshrl.u32 %v529_v35, 23  ;;  %v533_v39 = vand.u32 8388607, %v526_v34 }
  0x57   : > { %vm1485_vm1 = vcmp.le.f32.partialorder %v186_v32, 0.7853982 }
  0x58   : > { %v957_v40 = vadd.s32 4294967169, %v190_v36  ;;  %v962_v41 = vadd.s32 4294967169, %v530_v38  ;;  %v194_v43 = vor.u32 8388608, %v193_v37  ;;  %v534_v44 = vor.u32 8388608, %v533_v39 }
  0x5a   : > { %v196_v42 = vadd.s32 1, %v957_v40  ;;  %v536_v45 = vadd.s32 1, %v962_v41  ;;  %v1434_v50 = vshll.u32 %v194_v43, 8  ;;  %v1436_v52 = vshll.u32 %v534_v44, 8 }
  0x5c   : > { %vm197_vm2 = vcmp.gt.s32.totalorder %v196_v42, 0  ;;  %vm537_vm3 = vcmp.gt.s32.totalorder %v536_v45, 0 }
  0x5d   : > { %v198_v46 = vsel %vm197_vm2, %v196_v42, 0  ;;  %v538_v49 = vsel %vm537_vm3, %v536_v45, 0  ;;  %vm528_vm2 = vcmp.lt.s32.totalorder %v1424_v31, 0  ;;  %vm527_vm3 = vcmp.le.f32.partialorder %v526_v34, 0.7853982 }
  0x5e   : > { %v199_v47 = vshrl.u32 %v198_v46, 5  ;;  %v200_v48 = vand.u32 31, %v198_v46  ;;  %v540_v51 = vand.u32 31, %v538_v49  ;;  %v1438_v0 = vshrl.u32 %v538_v49, 5 }
  0x60   : > { %v201_v53 = vsub.s32 32, %v200_v48  ;;  %v203_v55 = vshll.u32 %v1282_v54, %v200_v48  ;;  %v206_v57 = vshll.u32 %v1283_v56, %v200_v48  ;;  %v209_v59 = vshll.u32 %v1284_v58, %v200_v48 }
  0x61   : > { %v212_v61 = vshll.u32 %v1285_v60, %v200_v48  ;;  %v215_v63 = vshll.u32 %v1286_v62, %v200_v48  ;;  %vm218_vm4 = vcmp.lt.s32.totalorder %v199_v47, 1  ;;  %vm219_vm5 = vcmp.lt.s32.totalorder %v199_v47, 2 }
  0x62   : > { %v202_v1 = vshrl.u32 %v1282_v54, %v201_v53  ;;  %v204_v2 = vshrl.u32 %v1283_v56, %v201_v53  ;;  %v207_v3 = vshrl.u32 %v1284_v58, %v201_v53  ;;  %v210_v4 = vshrl.u32 %v1285_v60, %v201_v53 }
  0x63   : > { %v213_v5 = vshrl.u32 %v1286_v62, %v201_v53  ;;  %v216_v7 = vshrl.u32 %v1287_v6, %v201_v53  ;;  %vm221_vm6 = vcmp.lt.s32.totalorder %v199_v47, 4  ;;  %v541_v11 = vsub.s32 32, %v540_v51 }
  0x64   : > { %v205_v8 = vor.u32 %v204_v2, %v203_v55  ;;  %v208_v9 = vor.u32 %v207_v3, %v206_v57  ;;  %v211_v10 = vor.u32 %v210_v4, %v209_v59  ;;  %vm220_vm7 = vcmp.lt.s32.totalorder %v199_v47, 3 }
  0x65   : > { %v214_v12 = vor.u32 %v213_v5, %v212_v61  ;;  %v217_v13 = vor.u32 %v216_v7, %v215_v63  ;;  %v543_v14 = vshll.u32 %v1282_v54, %v540_v51  ;;  %v546_v23 = vshll.u32 %v1283_v56, %v540_v51 }
  0x66   : > { %v222_v15 = vsel %vm218_vm4, %v202_v1, %v205_v8  ;;  %v223_v16 = vsel %vm221_vm6, %v211_v10, 2102212464  ;;  %v226_v17 = vsel %vm218_vm4, %v205_v8, %v208_v9  ;;  %v230_v19 = vsel %vm218_vm4, %v208_v9, %v211_v10 }
  0x67   : > { %v224_v20 = vsel %vm220_vm7, %v208_v9, %v223_v16  ;;  %v227_v21 = vsel %vm221_vm6, %v214_v12, 920167782  ;;  %v231_v22 = vsel %vm221_vm6, %v217_v13, 1326507024  ;;  %v542_v26 = vshrl.u32 %v1282_v54, %v541_v11 }
  0x68   : > { %v228_v24 = vsel %vm220_vm7, %v211_v10, %v227_v21  ;;  %v232_v25 = vsel %vm220_vm7, %v214_v12, %v231_v22  ;;  %v544_v27 = vshrl.u32 %v1283_v56, %v541_v11  ;;  %v225_v28 = vsel %vm219_vm5, %v222_v15, %v224_v20 }
  0x69   : > { %v229_v29 = vsel %vm219_vm5, %v226_v17, %v228_v24  ;;  %v233_v33 = vsel %vm219_vm5, %v230_v19, %v232_v25  ;;  %v547_v35 = vshrl.u32 %v1284_v58, %v541_v11  ;;  %v549_v42 = vshll.u32 %v1284_v58, %v540_v51 }
  0x6a   : > { %v1447_v36 = vmul.u32.u64.low %v1434_v50, %v233_v33  ;;  %v1448_v37 = vmul.u32.u64.high %v1434_v50, %v233_v33, %v1447_v36  ;;  %v1451_v38 = vmul.u32.u64.low %v1434_v50, %v229_v29  ;;  %v1452_v39 = vmul.u32.u64.high %v1434_v50, %v229_v29, %v1451_v38 }
  0x6b   : > { %v545_v40 = vor.u32 %v544_v27, %v543_v14  ;;  %v548_v41 = vor.u32 %v547_v35, %v546_v23  ;;  %v550_v43 = vshrl.u32 %v1285_v60, %v541_v11  ;;  %v552_v44 = vshll.u32 %v1285_v60, %v540_v51 }
  0x6c   : > { %v553_v45 = vshrl.u32 %v1286_v62, %v541_v11  ;;  %v555_v46 = vshll.u32 %v1286_v62, %v540_v51  ;;  %v556_v48 = vshrl.u32 %v1287_v6, %v541_v11  ;;  %v241_v47 = vmul.u32 %v1434_v50, %v225_v28 }
  0x6d   : > { %v551_v49 = vor.u32 %v550_v43, %v549_v42  ;;  %vm558_vm8 = vcmp.lt.s32.totalorder %v1438_v0, 1  ;;  %vm559_vm9 = vcmp.lt.s32.totalorder %v1438_v0, 2  ;;  %vm243_vm10 = vc.u32 %v1448_v37, %v1451_v38 }
  0x6e   : > { %v244_v53 = vadd.s32 1, %v1452_v39  ;;  %v554_v54 = vor.u32 %v553_v45, %v552_v44  ;;  %vm560_vm11 = vcmp.lt.s32.totalorder %v1438_v0, 3  ;;  %v557_v55 = vor.u32 %v556_v48, %v555_v46 }
  0x6f   : > { %vm561_vm12 = vcmp.lt.s32.totalorder %v1438_v0, 4  ;;  %v562_v56 = vsel %vm558_vm8, %v542_v26, %v545_v40  ;;  %v566_v51 = vsel %vm558_vm8, %v545_v40, %v548_v41  ;;  %v570_v59 = vsel %vm558_vm8, %v548_v41, %v551_v49 }
  0x70   : > { %v245_v57 = vsel %vm243_vm10, %v244_v53, %v1452_v39  ;;  %v563_v50 = vsel %vm561_vm12, %v551_v49, 2102212464  ;;  %v567_v58 = vsel %vm561_vm12, %v554_v54, 920167782  ;;  %v571_v63 = vsel %vm561_vm12, %v557_v55, 1326507024 }
  0x71   : > { %v246_v60 = vadd.s32 %v245_v57, %v241_v47  ;;  %v564_v61 = vsel %vm560_vm11, %v548_v41, %v563_v50  ;;  %v568_v62 = vsel %vm560_vm11, %v551_v49, %v567_v58  ;;  %v572_v3 = vsel %vm560_vm11, %v554_v54, %v571_v63 }
  0x72   : > { %v565_v1 = vsel %vm559_vm9, %v562_v56, %v564_v61  ;;  %v569_v2 = vsel %vm559_vm9, %v566_v51, %v568_v62  ;;  %v573_v5 = vsel %vm559_vm9, %v570_v59, %v572_v3  ;;  %v242_v25 = vadd.s32 %v1451_v38, %v1448_v37 }
  0x73   : > { %v247_v4 = vadd.s32 536870912, %v246_v60  ;;  %v1469_v6 = vmul.u32.u64.low %v1436_v52, %v569_v2  ;;  %v1470_v7 = vmul.u32.u64.high %v1436_v52, %v569_v2, %v1469_v6  ;;  %v581_v11 = vmul.u32 %v1436_v52, %v565_v1 }
  0x74   : > { %v1473_v8 = vmul.u32.u64.low %v1436_v52, %v573_v5  ;;  %v1474_v9 = vmul.u32.u64.high %v1436_v52, %v573_v5, %v1473_v8  ;;  %vm278_vm7 = vweird.f32 %v1422_v30  ;;  %vm290_vm8 = vcmask 523264  }
  0x75   : > { %v248_v10 = vshrl.u32 %v247_v4, 30  ;;  %v584_v13 = vadd.s32 1, %v1470_v7  ;;  %vm618_vm12 = vweird.f32 %v1424_v31 }
  0x76   : > { %vm583_vm13 = vc.u32 %v1474_v9, %v1469_v6  ;;  %v582_v45 = vadd.s32 %v1469_v6, %v1474_v9 }
  0x77   : > { %v249_v12 = vshll.u32 %v248_v10, 30  ;;  %v585_v0 = vsel %vm583_vm13, %v584_v13, %v1470_v7  ;;  %v272_v53 = vsub.s32 4, %v248_v10 }
  0x78   : > { %v586_v15 = vadd.s32 %v585_v0, %v581_v11 }
  0x79   : > { %v250_v14 = vsub.s32 %v246_v60, %v249_v12  ;;  %v273_v59 = vsel %vm188_vm0, %v272_v53, %v248_v10 }
  0x7a   : > { %v587_v17 = vadd.s32 536870912, %v586_v15  ;;  %v275_v32 = vsel %vm1485_vm1, 0, %v273_v59 }
  0x7b   : > { %v252_v16 = vsub.s32 0, %v250_v14  ;;  %v279_v3 = vadd.s32 3, %v275_v32 }
  0x7c   : > { %v588_v20 = vshrl.u32 %v587_v17, 30 }
  0x7d   : > { %v958_v19 = vmin.u32 %v252_v16, %v250_v14  ;;  %v280_v8 = vand.u32 3, %v279_v3 }
  0x7e   : > { %v589_v22 = vshll.u32 %v588_v20, 30  ;;  %v612_v2 = vsub.s32 4, %v588_v20 }
  0x7f   : > { %v254_v21 = vclz %v958_v19  ;;  %vm285_vm4 = vcmp.eq.s32.totalorder %v280_v8, 2  ;;  %vm282_vm5 = vcmp.eq.s32.totalorder %v280_v8, 0  ;;  %vm281_vm6 = vcmp.lt.s32.totalorder %v280_v8, 2 }
  0x80   : > { %v590_v24 = vsub.s32 %v586_v15, %v589_v22  ;;  %v613_v6 = vsel %vm528_vm2, %v612_v2, %v588_v20 }
  0x81   : > { %v959_v23 = vadd.s32 4294967294, %v254_v21  ;;  %v615_v9 = vsel %vm527_vm3, 0, %v613_v6 }
  0x82   : > { %v592_v26 = vsub.s32 0, %v590_v24  ;;  %v619_v13 = vadd.s32 3, %v615_v9 }
  0x83   : > { %vm960_vm14 = vcmp.lt.s32.totalorder %v959_v23, 0 }
  0x84   : > { %v257_v52 = vsel %vm960_vm14, 0, %v959_v23  ;;  %v963_v33 = vmin.u32 %v592_v26, %v590_v24  ;;  %v620_v16 = vand.u32 3, %v619_v13 }
  0x85   : > { %v258_v27 = vsub.s32 32, %v257_v52  ;;  %v259_v28 = vshll.u32 %v250_v14, %v257_v52  ;;  %v262_v29 = vsub.s32 4294967266, %v257_v52  ;;  %v1288_v52 = vmov 1966171168  }
  0x86   : > { %v594_v39 = vclz %v963_v33  ;;  %vm625_vm9 = vcmp.eq.s32.totalorder %v620_v16, 2  ;;  %vm622_vm10 = vcmp.eq.s32.totalorder %v620_v16, 0  ;;  %vm621_vm11 = vcmp.lt.s32.totalorder %v620_v16, 2 }
  0x87   : > { %v260_v35 = vshrl.u32 %v242_v25, %v258_v27  ;;  %v263_v36 = vadd.s32 127, %v262_v29  ;;  %v367_v26 = vunpack.c.l.s4 %v1288_v52 }
  0x88   : > { %v964_v42 = vadd.s32 4294967294, %v594_v39 }
  0x89   : > { %v261_v40 = vor.u32 %v260_v35, %v259_v28  ;;  %v264_v41 = vshll.u32 %v263_v36, 23  ;;  %v368_v27 = vunpack.c.0.s8 %v367_v26 }
  0x8a   : > { %vm965_vm15 = vcmp.lt.s32.totalorder %v964_v42, 0 }
  0x8b   : > { %v265_v43 = vor.u32 4788187, %v264_v41  ;;  %v268_v44 = vcvt.s32.f32 %v261_v40  ;;  %v597_v37 = vsel %vm965_vm15, 0, %v964_v42  ;;  %v1503_v28 = vsub.s32 %v368_v27, %v1412_v18  ;;  %v1514_v42 = vld [vmem:[#allocation5] sm:$0xff] }
  0x8c   : > { %v598_v38 = vsub.s32 32, %v597_v37  ;;  %v599_v48 = vshll.u32 %v590_v24, %v597_v37  ;;  %v602_v47 = vsub.s32 4294967266, %v597_v37 }
  0x8d   : > { %v266_v46 = vand.u32 2147483647, %v265_v43  ;;  %v1516_v43 = vld [vmem:[#allocation5 + $0x8] sm:$0xff] }
  0x8e   : > { %v600_v54 = vshrl.u32 %v582_v45, %v598_v38  ;;  %v603_v55 = vadd.s32 127, %v602_v47  ;;  %v1521_v38 = vld [vmem:[#allocation5 + $0x10] sm:$0xff] }
  0x8f   : > { %v269_v49 = vmul.f32 %v268_v44, %v266_v46 }
  0x90   : > { %v601_v57 = vor.u32 %v600_v54, %v599_v48  ;;  %v604_v50 = vshll.u32 %v603_v55, 23  ;;  %v1523_v48 = vld [vmem:[#allocation5 + $0x18] sm:$0xff] }
  0x91   : > { %v270_v51 = vxor.u32 2147483648, %v269_v49 }
  0x92   : > { %v605_v61 = vor.u32 4788187, %v604_v50  ;;  %v608_v62 = vcvt.s32.f32 %v601_v57 }
  0x93   : > { %v271_v58 = vsel %vm188_vm0, %v270_v51, %v269_v49 }
  0x94   : > { %v274_v60 = vsel %vm1485_vm1, %v1422_v30, %v271_v58  ;;  %v606_v63 = vand.u32 2147483647, %v605_v61 }
  0x95   : > { %1146 = vcosq.f32 %v274_v60 }
  0x96   : > { %1148 = vsinq.f32 %v274_v60  ;;  %v609_v1 = vmul.f32 %v608_v62, %v606_v63 }
  0x98   : > { %v610_v4 = vxor.u32 2147483648, %v609_v1 }
  0x9a   : > { %v611_v5 = vsel %vm528_vm2, %v610_v4, %v609_v1 }
  0x9b   : > { %v614_v7 = vsel %vm527_vm3, %v1424_v31, %v611_v5  ;;  %v1508_v31 = vsub.s32 0, %v1412_v18 }
  0x9c   : > { %1150 = vcosq.f32 %v614_v7 }
  0x9d   : > { %1152 = vsinq.f32 %v614_v7 }
  0xa2   : > { %v1147_v10 = vpop.eup %1146 }
  0xa3   : > { %v1149_v11 = vpop.eup %1148  ;;  %v286_v12 = vxor.u32 2147483648, %v1147_v10 }
  0xa4   : > { %v283_v14 = vxor.u32 2147483648, %v1149_v11 }
  0xa5   : > { %v287_v34 = vsel %vm285_vm4, %v286_v12, %v1149_v11 }
  0xa6   : > { %v284_v0 = vsel %vm282_vm5, %v1147_v10, %v283_v14 }
  0xa7   : > { %v288_v15 = vsel %vm281_vm6, %v284_v0, %v287_v34 }
  0xa8   : > { %v289_v17 = vsel %vm278_vm7, nan, %v288_v15 }
  0xa9   : > { %1042 = vmatmul.mubr.msk.f32.vlgmr.msra.gmra.mxu0 %vm290_vm8, %v289_v17  ;;  %v1151_v19 = vpop.eup %1150 }
  0xaa   : > { %v1153_v20 = vpop.eup %1152  ;;  %v626_v21 = vxor.u32 2147483648, %v1151_v19 }
  0xab   : > { %v623_v22 = vxor.u32 2147483648, %v1153_v20 }
  0xac   : > { %v627_v23 = vsel %vm625_vm9, %v626_v21, %v1153_v20 }
  0xad   : > { %v624_v30 = vsel %vm622_vm10, %v1151_v19, %v623_v22 }
  0xae   : > { %v628_v24 = vsel %vm621_vm11, %v624_v30, %v627_v23 }
  0xaf   : > { %v629_v25 = vsel %vm618_vm12, nan, %v628_v24 }
  0xb0   : > { %1061 = vmatmul.mubr.msk.f32.vlgmr.msra.gmra.mxu1 %vm290_vm8, %v629_v25 }
 0x169   : > { %v360_v29 = vpop.f32.mrf.mxu0 }
 0x16a   : > { %v365_v33 = vcombine.high %v360_v29, %v360_v29  ;;  %v372_v35 = vrot.slane %v360_v29, %v1503_v28 }
 0x16b   : > { %v1043_v36 = vpop.f32.mrf.mxu0 }
 0x16c   : > { %v379_v39 = vrot.slane %v365_v33, %v1503_v28  ;;  %v380_v40 = vcombine.high %v372_v35, %v372_v35  ;;  %v388_v41 = vrot.slane %v372_v35, %v1503_v28 }
 0x16e   : > { %v381_v44 = vcombine.high %v379_v39, %v379_v39  ;;  %v395_v45 = vrot.slane %v379_v39, %v1503_v28  ;;  %v402_v46 = vrot.slane %v380_v40, %v1503_v28  ;;  %v410_v37 = vcombine.high %v388_v41, %v388_v41 }
 0x16f   : > { %v417_v18 = vrot.slane %v388_v41, %v1508_v31 }
 0x170   : > { %v409_v47 = vrot.slane %v381_v44, %v1503_v28  ;;  %v411_v49 = vcombine.high %v395_v45, %v395_v45  ;;  %v412_v53 = vcombine.high %v402_v46, %v402_v46  ;;  %v421_v54 = vrot.slane %v402_v46, %v1508_v31  ;;  %v1534_v61 = vpop.f32.mrf.mxu1 }
 0x171   : > { %v425_v55 = vrot.slane %v410_v37, %v1508_v31  ;;  %v433_v56 = vrot.slane %v395_v45, %v1508_v31  ;;  %v454_v51 = vadd.f32 %v417_v18, %v1514_v42  ;;  %v455_v57 = vadd.f32 %v417_v18, %v1516_v43 }
 0x172   : > { %v413_v50 = vcombine.high %v409_v47, %v409_v47  ;;  %v429_v58 = vrot.slane %v412_v53, %v1508_v31  ;;  %v437_v59 = vrot.slane %v409_v47, %v1508_v31  ;;  %v441_v60 = vrot.slane %v411_v49, %v1508_v31  ;;  %v1062_v6 = vpop.f32.mrf.mxu1 }
 0x173   : > { %v456_v62 = vadd.f32 %v417_v18, %v1521_v38  ;;  %v457_v63 = vadd.f32 %v417_v18, %v1523_v48  ;;  %v458_v32 = vadd.f32 %v421_v54, %v1514_v42  ;;  %v459_v1 = vadd.f32 %v421_v54, %v1516_v43  ;;  %488 = vst [vmem:[%s1540_s17] sm:$0xff] %v454_v51 }
 0x174   : > { %489 = vst [vmem:[%s1540_s17 + $0x8] sm:$0xff] %v455_v57  ;;  %v445_v2 = vrot.slane %v413_v50, %v1508_v31  ;;  %v460_v3 = vadd.f32 %v421_v54, %v1521_v38  ;;  %v461_v4 = vadd.f32 %v421_v54, %v1523_v48  ;;  %v462_v5 = vadd.f32 %v425_v55, %v1514_v42 }
 0x175   : > { %v463_v7 = vadd.f32 %v425_v55, %v1516_v43  ;;  %v464_v8 = vadd.f32 %v425_v55, %v1521_v38  ;;  %v465_v9 = vadd.f32 %v425_v55, %v1523_v48  ;;  %v466_v10 = vadd.f32 %v429_v58, %v1514_v42  ;;  %490 = vst [vmem:[%s1540_s17 + $0x10] sm:$0xff] %v456_v62 }
 0x176   : > { %491 = vst [vmem:[%s1540_s17 + $0x18] sm:$0xff] %v457_v63  ;;  %492 = vst [vmem:[%s1540_s17 + $0x20] sm:$0xff] %v458_v32  ;;  %v467_v11 = vadd.f32 %v429_v58, %v1516_v43  ;;  %v468_v12 = vadd.f32 %v429_v58, %v1521_v38  ;;  %v469_v13 = vadd.f32 %v429_v58, %v1523_v48 }
 0x177   : > { %493 = vst [vmem:[%s1540_s17 + $0x28] sm:$0xff] %v459_v1  ;;  %v470_v14 = vadd.f32 %v433_v56, %v1514_v42  ;;  %494 = vst [vmem:[%s1540_s17 + $0x30] sm:$0xff] %v460_v3  ;;  %v471_v34 = vadd.f32 %v433_v56, %v1516_v43  ;;  %v472_v0 = vadd.f32 %v433_v56, %v1521_v38 }
 0x178   : > { %495 = vst [vmem:[%s1540_s17 + $0x38] sm:$0xff] %v461_v4  ;;  %496 = vst [vmem:[%s1540_s17 + $0x40] sm:$0xff] %v462_v5  ;;  %v473_v15 = vadd.f32 %v433_v56, %v1523_v48  ;;  %v474_v16 = vadd.f32 %v437_v59, %v1514_v42  ;;  %v475_v17 = vadd.f32 %v437_v59, %v1516_v43 }
 0x179   : > { %497 = vst [vmem:[%s1540_s17 + $0x48] sm:$0xff] %v463_v7  ;;  %498 = vst [vmem:[%s1540_s17 + $0x50] sm:$0xff] %v464_v8  ;;  %v476_v19 = vadd.f32 %v437_v59, %v1521_v38  ;;  %v477_v20 = vadd.f32 %v437_v59, %v1523_v48  ;;  %v478_v21 = vadd.f32 %v441_v60, %v1514_v42 }
 0x17a   : > { %499 = vst [vmem:[%s1540_s17 + $0x58] sm:$0xff] %v465_v9  ;;  %500 = vst [vmem:[%s1540_s17 + $0x60] sm:$0xff] %v466_v10  ;;  %v479_v22 = vadd.f32 %v441_v60, %v1516_v43  ;;  %v480_v23 = vadd.f32 %v441_v60, %v1521_v38  ;;  %v481_v30 = vadd.f32 %v441_v60, %v1523_v48 }
 0x17b   : > { %501 = vst [vmem:[%s1540_s17 + $0x68] sm:$0xff] %v467_v11  ;;  %502 = vst [vmem:[%s1540_s17 + $0x70] sm:$0xff] %v468_v12  ;;  %v482_v24 = vadd.f32 %v445_v2, %v1514_v42  ;;  %v483_v25 = vadd.f32 %v445_v2, %v1516_v43  ;;  %v484_v52 = vadd.f32 %v445_v2, %v1521_v38 }
 0x17c   : > { %503 = vst [vmem:[%s1540_s17 + $0x78] sm:$0xff] %v469_v13  ;;  %504 = vst [vmem:[%s1540_s17 + $0x80] sm:$0xff] %v470_v14  ;;  %v485_v26 = vadd.f32 %v445_v2, %v1523_v48  ;;  %v704_v27 = vcombine.high %v1534_v61, %v1534_v61  ;;  %v711_v29 = vrot.slane %v1534_v61, %v1503_v28 }
 0x17d   : > { %505 = vst [vmem:[%s1540_s17 + $0x88] sm:$0xff] %v471_v34  ;;  %506 = vst [vmem:[%s1540_s17 + $0x90] sm:$0xff] %v472_v0 }
 0x17e   : > { %507 = vst [vmem:[%s1540_s17 + $0x98] sm:$0xff] %v473_v15  ;;  %508 = vst [vmem:[%s1540_s17 + $0xa0] sm:$0xff] %v474_v16  ;;  %v718_v33 = vrot.slane %v704_v27, %v1503_v28  ;;  %v719_v35 = vcombine.high %v711_v29, %v711_v29  ;;  %v727_v36 = vrot.slane %v711_v29, %v1503_v28 }
 0x17f   : > { %509 = vst [vmem:[%s1540_s17 + $0xa8] sm:$0xff] %v475_v17  ;;  %510 = vst [vmem:[%s1540_s17 + $0xb0] sm:$0xff] %v476_v19 }
 0x180   : > { %511 = vst [vmem:[%s1540_s17 + $0xb8] sm:$0xff] %v477_v20  ;;  %512 = vst [vmem:[%s1540_s17 + $0xc0] sm:$0xff] %v478_v21  ;;  %v720_v39 = vcombine.high %v718_v33, %v718_v33  ;;  %v734_v40 = vrot.slane %v718_v33, %v1503_v28  ;;  %v741_v41 = vrot.slane %v719_v35, %v1503_v28 }
 0x181   : > { %513 = vst [vmem:[%s1540_s17 + $0xc8] sm:$0xff] %v479_v22  ;;  %514 = vst [vmem:[%s1540_s17 + $0xd0] sm:$0xff] %v480_v23  ;;  %v749_v44 = vcombine.high %v727_v36, %v727_v36  ;;  %v756_v45 = vrot.slane %v727_v36, %v1508_v31 }
 0x182   : > { %515 = vst [vmem:[%s1540_s17 + $0xd8] sm:$0xff] %v481_v30  ;;  %516 = vst [vmem:[%s1540_s17 + $0xe0] sm:$0xff] %v482_v24  ;;  %v748_v46 = vrot.slane %v720_v39, %v1503_v28  ;;  %v750_v37 = vcombine.high %v734_v40, %v734_v40  ;;  %v772_v18 = vrot.slane %v734_v40, %v1508_v31 }
 0x183   : > { %517 = vst [vmem:[%s1540_s17 + $0xe8] sm:$0xff] %v483_v25  ;;  %518 = vst [vmem:[%s1540_s17 + $0xf0] sm:$0xff] %v484_v52  ;;  %v751_v47 = vcombine.high %v741_v41, %v741_v41  ;;  %v760_v49 = vrot.slane %v741_v41, %v1508_v31  ;;  %v764_v53 = vrot.slane %v749_v44, %v1508_v31 }
 0x184   : > { %519 = vst [vmem:[%s1540_s17 + $0xf8] sm:$0xff] %v485_v26  ;;  %v793_v54 = vadd.f32 %v756_v45, %v1514_v42  ;;  %v752_v55 = vcombine.high %v748_v46, %v748_v46  ;;  %v776_v56 = vrot.slane %v748_v46, %v1508_v31  ;;  %v780_v51 = vrot.slane %v750_v37, %v1508_v31 }
 0x185   : > { %v794_v57 = vadd.f32 %v756_v45, %v1516_v43  ;;  %v768_v28 = vrot.slane %v751_v47, %v1508_v31  ;;  %v795_v50 = vadd.f32 %v756_v45, %v1521_v38  ;;  %v796_v58 = vadd.f32 %v756_v45, %v1523_v48 }
 0x186   : > { %v797_v59 = vadd.f32 %v760_v49, %v1514_v42  ;;  %967 = vst [vmem:[%s1540_s17 + $0x100] sm:$0xff] %v793_v54  ;;  %v784_v60 = vrot.slane %v752_v55, %v1508_v31  ;;  %v798_v61 = vadd.f32 %v760_v49, %v1516_v43  ;;  %v799_v62 = vadd.f32 %v760_v49, %v1521_v38 }
 0x187   : > { %v800_v63 = vadd.f32 %v760_v49, %v1523_v48  ;;  %968 = vst [vmem:[%s1540_s17 + $0x108] sm:$0xff] %v794_v57  ;;  %v801_v32 = vadd.f32 %v764_v53, %v1514_v42  ;;  %v802_v1 = vadd.f32 %v764_v53, %v1516_v43  ;;  %v803_v2 = vadd.f32 %v764_v53, %v1521_v38 }
 0x188   : > { %v804_v31 = vadd.f32 %v764_v53, %v1523_v48  ;;  %969 = vst [vmem:[%s1540_s17 + $0x110] sm:$0xff] %v795_v50  ;;  %970 = vst [vmem:[%s1540_s17 + $0x118] sm:$0xff] %v796_v58  ;;  %v805_v3 = vadd.f32 %v768_v28, %v1514_v42  ;;  %v806_v4 = vadd.f32 %v768_v28, %v1516_v43 }
 0x189   : > { %971 = vst [vmem:[%s1540_s17 + $0x120] sm:$0xff] %v797_v59  ;;  %v807_v5 = vadd.f32 %v768_v28, %v1521_v38  ;;  %v808_v6 = vadd.f32 %v768_v28, %v1523_v48  ;;  %972 = vst [vmem:[%s1540_s17 + $0x128] sm:$0xff] %v798_v61  ;;  %v809_v7 = vadd.f32 %v772_v18, %v1514_v42 }
 0x18a   : > { %973 = vst [vmem:[%s1540_s17 + $0x130] sm:$0xff] %v799_v62  ;;  %974 = vst [vmem:[%s1540_s17 + $0x138] sm:$0xff] %v800_v63  ;;  %v810_v8 = vadd.f32 %v772_v18, %v1516_v43  ;;  %v811_v9 = vadd.f32 %v772_v18, %v1521_v38  ;;  %v812_v10 = vadd.f32 %v772_v18, %v1523_v48 }
 0x18b   : > { %975 = vst [vmem:[%s1540_s17 + $0x140] sm:$0xff] %v801_v32  ;;  %976 = vst [vmem:[%s1540_s17 + $0x148] sm:$0xff] %v802_v1  ;;  %v813_v11 = vadd.f32 %v776_v56, %v1514_v42  ;;  %v814_v12 = vadd.f32 %v776_v56, %v1516_v43  ;;  %v815_v13 = vadd.f32 %v776_v56, %v1521_v38 }
 0x18c   : > { %977 = vst [vmem:[%s1540_s17 + $0x150] sm:$0xff] %v803_v2  ;;  %978 = vst [vmem:[%s1540_s17 + $0x158] sm:$0xff] %v804_v31  ;;  %v816_v14 = vadd.f32 %v776_v56, %v1523_v48  ;;  %v817_v34 = vadd.f32 %v780_v51, %v1514_v42  ;;  %v818_v0 = vadd.f32 %v780_v51, %v1516_v43 }
 0x18d   : > { %979 = vst [vmem:[%s1540_s17 + $0x160] sm:$0xff] %v805_v3  ;;  %980 = vst [vmem:[%s1540_s17 + $0x168] sm:$0xff] %v806_v4  ;;  %v819_v15 = vadd.f32 %v780_v51, %v1521_v38  ;;  %v820_v16 = vadd.f32 %v780_v51, %v1523_v48  ;;  %v821_v17 = vadd.f32 %v784_v60, %v1514_v42 }
 0x18e   : > { %981 = vst [vmem:[%s1540_s17 + $0x170] sm:$0xff] %v807_v5  ;;  %982 = vst [vmem:[%s1540_s17 + $0x178] sm:$0xff] %v808_v6  ;;  %v822_v19 = vadd.f32 %v784_v60, %v1516_v43  ;;  %v823_v20 = vadd.f32 %v784_v60, %v1521_v38  ;;  %v824_v21 = vadd.f32 %v784_v60, %v1523_v48 }
 0x18f   : > { %983 = vst [vmem:[%s1540_s17 + $0x180] sm:$0xff] %v809_v7  ;;  %984 = vst [vmem:[%s1540_s17 + $0x188] sm:$0xff] %v810_v8 }
 0x190   : > { %985 = vst [vmem:[%s1540_s17 + $0x190] sm:$0xff] %v811_v9  ;;  %986 = vst [vmem:[%s1540_s17 + $0x198] sm:$0xff] %v812_v10 }
 0x191   : > { %987 = vst [vmem:[%s1540_s17 + $0x1a0] sm:$0xff] %v813_v11  ;;  %988 = vst [vmem:[%s1540_s17 + $0x1a8] sm:$0xff] %v814_v12 }
 0x192   : > { %989 = vst [vmem:[%s1540_s17 + $0x1b0] sm:$0xff] %v815_v13  ;;  %990 = vst [vmem:[%s1540_s17 + $0x1b8] sm:$0xff] %v816_v14 }
 0x193   : > { %991 = vst [vmem:[%s1540_s17 + $0x1c0] sm:$0xff] %v817_v34  ;;  %992 = vst [vmem:[%s1540_s17 + $0x1c8] sm:$0xff] %v818_v0 }
 0x194   : > { %993 = vst [vmem:[%s1540_s17 + $0x1d0] sm:$0xff] %v819_v15  ;;  %994 = vst [vmem:[%s1540_s17 + $0x1d8] sm:$0xff] %v820_v16 }
 0x195   : > { %995 = vst [vmem:[%s1540_s17 + $0x1e0] sm:$0xff] %v821_v17  ;;  %996 = vst [vmem:[%s1540_s17 + $0x1e8] sm:$0xff] %v822_v19 }
 0x196   : > { %997 = vst [vmem:[%s1540_s17 + $0x1f0] sm:$0xff] %v823_v20  ;;  %998 = vst [vmem:[%s1540_s17 + $0x1f8] sm:$0xff] %v824_v21 }
 0x197   : > { %1219 = shalt.err (!%p1216_p1)
}
 0x198   : > { %s1220_s30 = scalar_lea.hbm %s1671_s24, 8192  ;;  %s1224_s5 = scalar_lea.hbm %s1735_s2, 16384 }
 0x199   : > { %p1221_p3 = scmp.ne.s32.totalorder %s1671_s24, %s1220_s30  ;;  %p1225_p13 = scmp.lt.s32.totalorder %s1671_s24, %s1735_s2 }
 0x19a   : > { %p1226_p7 = scmp.lt.s32.totalorder %s1224_s5, %s1220_s30 }
 0x19b   : > { %p1222_p2 = pnand %p1221_p3, %p1345_p5 }
 0x19c   : > { %p1227_p6 = por %p1226_p7, %p1225_p13 }
 0x19d   : > { %p1223_p4 = pneg %p1222_p2 }
 0x19f   : > { %p1228_p9 = pnand %p1227_p6, %p1223_p4 }
 0x1a1   : > { %1231 = shalt.err (!%p1228_p9)
}
 0x1a2   : > { %s1290_s8 = smov 128   ;;  %s1291_s14 = smov 8  }
 0x1a3   : > { %1079 = dma.vmem_to_hbm [thread:$0]  (%p1345_p5), %s1673_s22, 8192, %s1671_s24, %s1693_s25, %s1290_s8, %s1290_s8, %s1291_s14  }
 0x1a4 PF: > { %p1096_p10 = scmp.ge.s32.totalorder %s1274_s12, 2  ;;  %s889_s16 = sand.u32 1, %s1262_s9  }
 0x1a5   : > { %p1747_p12 = scmp.ne.s32.totalorder %s1738_s20, 0  ;;  %s890_s17 = scalar_lea.sflag [#allocation4], %s889_s16 }
 0x1a7   : > { %p1089_p8 = pnand %p1096_p10, %p1747_p12 }
 0x1a9   : > { %p1090_p11 = pneg %p1089_p8 }
 0x1ab   : > { %1257 = dma.done.wait (%p1090_p11), %s890_s17, 8192  }
 0x1ac   : > { %1259 = vsyncadd (%p1090_p11), %s890_s17, 4294959104  ;;  %p14_p0 = scmp.ge.s32.totalorder %s1332_s15, 4   ;;  %s1748_s9 = smov %s1266_s10 }
 0x1ad   : > { %s1749_s10 = smov %s1270_s11  ;;  %s1750_s11 = smov %s1343_s18 }
 0x1ae   : > { %s1751_s12 = smov %s1332_s15  ;;  %16 = sbr.rel (!%p14_p0) target bundleno = 5 (0x5), region = 71 }
 0x1b3   :  { %895 = vsyncpa [#allocation3], 1 }
 0x1b4   :  { %897 = vsyncpa [#allocation3 + $0x1], 1 }
 0x1b5   :  { %898 = vsyncpa [#allocation6], 1 }
 0x1b6   :  { %899 = vsyncpa [#allocation4], 1 }
 0x1b7   :  { %901 = vsyncpa [#allocation4 + $0x1], 1 }

</bundles_post_ra>
